<compile_context>
chip_gen: v5e
topology: v5e:2x2
jax: 0.10.0
libtpu: 0.0.40
codegen_flags: <defaults>
</compile_context>

<pallas_src>
import functools

import jax
import jax.numpy as jnp
import numpy as np
from jax import lax
from jax.experimental import pallas as pl
from jax.experimental.pallas import tpu as pltpu

# Single cross-generation scoped-VMEM budget: well above the 16/32 MiB scoped defaults
# (v5e/v6e) and below v7x's 64 MiB physical VMEM.  (Per-chip tuning: ~100 MiB on v5e/v6e,
# ~56-60 MiB on v7x.)
_VMEM_LIMIT_BYTES = 48 * 1024 * 1024


def gn_qkv_kernel(x_ref, wqkv_ref, bqkv_ref, qkv_ref, *, eps):
    """GroupNorm(1) with two-pass stats + folded-affine/scaled 1x1 qkv projection, one sample."""
    x = x_ref[0].astype(jnp.float32)                    # [C, HW]
    mean = jnp.mean(x)
    xc = x - mean
    var = jnp.mean(xc * xc)                             # two-pass variance (stable)
    xn = (xc * lax.rsqrt(var + eps)).astype(jnp.bfloat16)
    # GroupNorm affine and the d**-0.25 q/k scale are folded into wqkv/bqkv on the host.
    qkv = jnp.dot(wqkv_ref[...], xn, preferred_element_type=jnp.float32) + bqkv_ref[...]
    qkv_ref[0] = qkv.astype(qkv_ref.dtype)


def flash_attn_out_kernel(q_ref, k_ref, v_ref, x_ref, wout_ref, bout_ref, o_ref,
                          m_sc, l_sc, acc_sc, *, n_head):
    """Online-softmax attention over KV tiles + fused out-projection/bias/residual at finalize."""
    ki = pl.program_id(2)

    @pl.when(ki == 0)
    def _init():
        m_sc[...] = jnp.full(m_sc.shape, -jnp.inf, jnp.float32)
        l_sc[...] = jnp.zeros(l_sc.shape, jnp.float32)
        acc_sc[...] = jnp.zeros(acc_sc.shape, jnp.float32)

    q = q_ref[0]                                        # [C, tq]  bf16
    k = k_ref[0]                                        # [C, tkv] bf16
    v = v_ref[0]                                        # [C, tkv] bf16
    c = q.shape[0]
    d = c // n_head

    # Static unroll is right for small n_head.
    # TODO(synk): for large n_head switch to lax.fori_loop + pl.ds head slicing to bound vreg
    # live ranges (and pick d as a multiple of 8/16 sublanes so head slices are aligned views).
    for h in range(n_head):
        lo = h * d
        q_h = q[lo:lo + d, :]                           # [d, tq]
        k_h = k[lo:lo + d, :]                           # [d, tkv]
        v_h = v[lo:lo + d, :]                           # [d, tkv]

        # Scores in [keys-on-sublanes, queries-on-lanes] orientation via a transposed-LHS
        # contraction: no materialized transpose anywhere in the kernel.
        s = lax.dot_general(k_h, q_h, (((0,), (0,)), ((), ())),
                            preferred_element_type=jnp.float32)            # [tkv, tq] f32

        m_prev = m_sc[h:h + 1, :]                                           # [1, tq]
        l_prev = l_sc[h:h + 1, :]
        m_new = jnp.maximum(m_prev, jnp.max(s, axis=0, keepdims=True))      # [1, tq]
        alpha = jnp.exp(m_prev - m_new)                                     # [1, tq]
        p = jnp.exp(s - m_new)                                              # [tkv, tq] unnormalized
        l_sc[h:h + 1, :] = alpha * l_prev + jnp.sum(p, axis=0, keepdims=True)
        m_sc[h:h + 1, :] = m_new
        acc_sc[lo:lo + d, :] = alpha * acc_sc[lo:lo + d, :] + jnp.dot(
            v_h, p.astype(jnp.bfloat16), preferred_element_type=jnp.float32)  # [d, tq]

    @pl.when(ki == pl.num_programs(2) - 1)
    def _finalize():
        # Deferred softmax normalization: one [d, tq] scale per head (EUP approx reciprocal)
        # instead of scaling the [tkv, tq] probabilities on every KV step.
        inv_l = pl.reciprocal(l_sc[...], approx=True)                       # [n_head, tq]
        for h in range(n_head):
            lo = h * d
            acc_sc[lo:lo + d, :] = acc_sc[lo:lo + d, :] * inv_l[h:h + 1, :]
        y = acc_sc[...].astype(jnp.bfloat16)                                # [C, tq] all heads
        out = (x_ref[0].astype(jnp.float32) + bout_ref[...]
               + jnp.dot(wout_ref[...], y, preferred_element_type=jnp.float32))  # one K=C matmul
        o_ref[0] = out.astype(o_ref.dtype)


def self_attention_2d(x_nchw, params, *, n_head=1, eps=1e-5, block_q=128, block_kv=128):
    n, c, h, w = x_nchw.shape
    hw = h * w
    assert c % n_head == 0
    d = c // n_head
    assert c % 8 == 0, "C must be a multiple of 8 (sublane tiling & q/k/v row-band indexing)"
    tq = min(block_q, hw)
    tkv = min(block_kv, hw)
    assert hw % tq == 0 and hw % tkv == 0 and tq % 128 == 0 and tkv % 128 == 0, \
        "H*W must be a multiple of 128 and of the Q/KV tile sizes"

    f32 = jnp.float32
    x_seq = x_nchw.reshape(n, c, hw)                    # free reshape: [N, C, HW]

    # ---- host-side weight prep: fold GroupNorm affine + d**-0.25 q/k scale into the qkv proj ---
    w_qkv = params["w_qkv"].astype(f32)                 # [3C, C]
    b_qkv = params["b_qkv"].astype(f32)                 # [3C]
    gnw = params["gn_weight"].astype(f32)               # [C]
    gnb = params["gn_bias"].astype(f32)                 # [C]
    scale = d ** (-0.25)
    row_scale = jnp.concatenate([jnp.full((2 * c,), scale, f32), jnp.ones((c,), f32)])
    w_fold = (w_qkv * gnw[None, :]) * row_scale[:, None]
    b_fold = (b_qkv + w_qkv @ gnb) * row_scale
    wqkv_bf = w_fold.astype(jnp.bfloat16)
    bqkv = b_fold.reshape(3 * c, 1)                     # f32, added after the f32-accumulated matmul
    wout_bf = params["w_out"].astype(jnp.bfloat16)      # [C, C]
    bout = params["b_out"].astype(f32).reshape(c, 1)

    # ---- kernel 1: per-sample GroupNorm + qkv projection -> bf16 [N, 3C, HW] ----
    qkv = pl.pallas_call(
        functools.partial(gn_qkv_kernel, eps=eps),
        out_shape=jax.ShapeDtypeStruct((n, 3 * c, hw), jnp.bfloat16),
        grid_spec=pltpu.PrefetchScalarGridSpec(
            num_scalar_prefetch=0,
            grid=(n,),
            in_specs=[
                pl.BlockSpec((1, c, hw), lambda i: (i, 0, 0)),            # x
                pl.BlockSpec((3 * c, c), lambda i: (0, 0)),               # folded qkv weight (bf16)
                pl.BlockSpec((3 * c, 1), lambda i: (0, 0)),               # folded qkv bias (f32)
            ],
            out_specs=pl.BlockSpec((1, 3 * c, hw), lambda i: (i, 0, 0)),
        ),
        compiler_params=pltpu.CompilerParams(
            dimension_semantics=("parallel",),
            vmem_limit_bytes=_VMEM_LIMIT_BYTES),
    )(x_seq, wqkv_bf, bqkv)

    # ---- kernel 2: flash attention (Q parallel, KV arbitrary) + out proj + residual ----
    # qkv is passed three times; the second block axis (block size C over the 3C rows) selects
    # the q / k / v row band via block indices 0 / 1 / 2 -- no host-side slicing or copies.
    kernel = functools.partial(flash_attn_out_kernel, n_head=n_head)
    out_seq = pl.pallas_call(
        kernel,
        out_shape=jax.ShapeDtypeStruct((n, c, hw), x_nchw.dtype),
        grid_spec=pltpu.PrefetchScalarGridSpec(
            num_scalar_prefetch=0,
            grid=(n, hw // tq, hw // tkv),
            in_specs=[
                pl.BlockSpec((1, c, tq), lambda i, qi, ki: (i, 0, qi)),   # q rows [0:C]
                pl.BlockSpec((1, c, tkv), lambda i, qi, ki: (i, 1, ki)),  # k rows [C:2C]
                pl.BlockSpec((1, c, tkv), lambda i, qi, ki: (i, 2, ki)),  # v rows [2C:3C]
                pl.BlockSpec((1, c, tq), lambda i, qi, ki: (i, 0, qi)),   # x (residual, f32)
                # NOTE: constant-index weight specs; production could add
                # pipeline_mode=pl.Buffered(1) to drop their second VMEM buffer.
                pl.BlockSpec((c, c), lambda i, qi, ki: (0, 0)),           # wout (bf16)
                pl.BlockSpec((c, 1), lambda i, qi, ki: (0, 0)),           # bout (f32)
            ],
            out_specs=pl.BlockSpec((1, c, tq), lambda i, qi, ki: (i, 0, qi)),
            scratch_shapes=[
                pltpu.VMEM((n_head, tq), jnp.float32),   # m: running row max per head
                pltpu.VMEM((n_head, tq), jnp.float32),   # l: running softmax denom per head
                pltpu.VMEM((c, tq), jnp.float32),        # y accumulator, all heads stacked
            ],
        ),
        compiler_params=pltpu.CompilerParams(
            dimension_semantics=("parallel", "parallel", "arbitrary"),
            vmem_limit_bytes=_VMEM_LIMIT_BYTES),
    )(qkv, qkv, qkv, x_seq, wout_bf, bout)

    return out_seq.reshape(n, c, h, w)                  # free reshape back to NCHW


def reference(x, params, *, n_head, eps=1e-5):
    """Pure-JAX (f32) mirror of the PyTorch forward, for the correctness check."""
    n, c, h, w = x.shape
    hw = h * w
    xf = x.reshape(n, -1)
    mean = jnp.mean(xf, axis=1).reshape(n, 1, 1, 1)
    var = jnp.mean(jnp.square(xf - jnp.mean(xf, axis=1, keepdims=True)),
                   axis=1).reshape(n, 1, 1, 1)
    xn = (x - mean) / jnp.sqrt(var + eps)
    xn = xn * params["gn_weight"].reshape(1, c, 1, 1) + params["gn_bias"].reshape(1, c, 1, 1)
    qkv = jnp.einsum('nchw,oc->nohw', xn, params["w_qkv"]) + params["b_qkv"].reshape(1, 3 * c, 1, 1)
    qkv = qkv.reshape(n, n_head * 3, c // n_head, hw).transpose(0, 1, 3, 2)
    q, k, v = jnp.split(qkv, 3, axis=1)
    d = c // n_head
    scale = d ** (-0.25)
    att = jnp.einsum('nhqd,nhkd->nhqk', q * scale, k * scale)
    att = jax.nn.softmax(att, axis=-1)
    y = jnp.einsum('nhqk,nhkd->nhqd', att, v)
    y = y.transpose(0, 1, 3, 2).reshape(n, c, h, w)
    out = jnp.einsum('nchw,oc->nohw', y, params["w_out"]) + params["b_out"].reshape(1, c, 1, 1)
    return x + out


if __name__ == "__main__":
    N, C, H, W = 2, 8, 16, 16
    N_HEAD = 2

    key = jax.random.PRNGKey(0)
    kx, k1, k2, k3, k4, k5, k6 = jax.random.split(key, 7)

    x = jax.random.normal(kx, (N, C, H, W), dtype=jnp.float32)

    # Deterministic synthetic parameters (shapes match the PyTorch module's __init__).
    params = {
        "gn_weight": 1.0 + 0.1 * jax.random.normal(k1, (C,), dtype=jnp.float32),
        "gn_bias": 0.1 * jax.random.normal(k2, (C,), dtype=jnp.float32),
        "w_qkv": 0.2 * jax.random.normal(k3, (3 * C, C), dtype=jnp.float32),  # Conv2d(C, 3C, 1) squeezed
        "b_qkv": 0.1 * jax.random.normal(k4, (3 * C,), dtype=jnp.float32),
        "w_out": 0.2 * jax.random.normal(k5, (C, C), dtype=jnp.float32),      # Conv2d(C, C, 1) squeezed
        "b_out": 0.1 * jax.random.normal(k6, (C,), dtype=jnp.float32),
    }

    # block_q/block_kv=128 at demo H*W=256 exercises the multi-tile online-softmax path
    # (grid = (2, 2, 2)); use 512 for production 64x64 inputs.
    out = self_attention_2d(x, params, n_head=N_HEAD, block_q=128, block_kv=128)
    out = jax.block_until_ready(out)

    ref = reference(x, params, n_head=N_HEAD)
    # Tolerance reflects bf16 MXU operands (q/k/v, p, y, weights) with f32 accumulation plus the
    # approximate (EUP) softmax reciprocal; stats/exp/max/sums stay in f32.
    np.testing.assert_allclose(np.asarray(out), np.asarray(ref), atol=3e-2, rtol=3e-2)

    print("KERNEL_OK")
</pallas_src>

<mosaic_0001>
module attributes {stable_mosaic.version = 11 : i64} {
  func.func @gn_qkv_kernel(%arg0: i32, %arg1: memref<1x8x256xf32, #tpu.memory_space<vmem>>, %arg2: memref<24x8xbf16, #tpu.memory_space<vmem>>, %arg3: memref<24x1xf32, #tpu.memory_space<vmem>>, %arg4: memref<1x24x256xbf16, #tpu.memory_space<vmem>>) attributes {dimension_semantics = [#tpu.dimension_semantics<parallel>], iteration_bounds = array<i64: 2>, scalar_prefetch = 0 : i64, scratch_operands = 0 : i64, tpu.core_type = #tpu.core_type<tc>, window_params = [{transform_indices = @transform_0, window_bounds = array<i64: 1, 8, 256>}, {pipeline_mode = #tpu.pipeline_mode<synchronous>, transform_indices = @transform_1, window_bounds = array<i64: 24, 8>}, {pipeline_mode = #tpu.pipeline_mode<synchronous>, transform_indices = @transform_2, window_bounds = array<i64: 24, 1>}, {transform_indices = @transform_3, window_bounds = array<i64: 1, 24, 256>}]} {
    %c0 = arith.constant 0 : index
    %c0_0 = arith.constant 0 : index
    %c0_1 = arith.constant 0 : index
    %0 = vector.load %arg1[%c0, %c0_0, %c0_1] : memref<1x8x256xf32, #tpu.memory_space<vmem>>, vector<1x8x256xf32>
    %1 = vector.shape_cast %0 : vector<1x8x256xf32> to vector<8x256xf32>
    %2 = vector.shape_cast %1 : vector<8x256xf32> to vector<1x8x256xf32>
    %cst = arith.constant dense<0.000000e+00> : vector<1xf32>
    %3 = vector.multi_reduction <add>, %2, %cst [1, 2] : vector<1x8x256xf32> to vector<1xf32>
    %4 = vector.shape_cast %3 : vector<1xf32> to vector<1x1x1xf32>
    %5 = vector.extract %4[0, 0, 0] : f32 from vector<1x1x1xf32>
    %cst_2 = arith.constant 2.048000e+03 : f32
    %6 = arith.divf %5, %cst_2 : f32
    %7 = vector.broadcast %6 : f32 to vector<8x256xf32>
    %8 = arith.subf %1, %7 : vector<8x256xf32>
    %9 = arith.mulf %8, %8 : vector<8x256xf32>
    %10 = vector.shape_cast %9 : vector<8x256xf32> to vector<1x8x256xf32>
    %cst_3 = arith.constant dense<0.000000e+00> : vector<1xf32>
    %11 = vector.multi_reduction <add>, %10, %cst_3 [1, 2] : vector<1x8x256xf32> to vector<1xf32>
    %12 = vector.shape_cast %11 : vector<1xf32> to vector<1x1x1xf32>
    %13 = vector.extract %12[0, 0, 0] : f32 from vector<1x1x1xf32>
    %cst_4 = arith.constant 2.048000e+03 : f32
    %14 = arith.divf %13, %cst_4 : f32
    %cst_5 = arith.constant 9.99999974E-6 : f32
    %15 = arith.addf %14, %cst_5 : f32
    %16 = math.rsqrt %15 : f32
    %17 = vector.broadcast %16 : f32 to vector<8x256xf32>
    %18 = arith.mulf %8, %17 : vector<8x256xf32>
    %19 = arith.truncf %18 : vector<8x256xf32> to vector<8x256xbf16>
    %c0_6 = arith.constant 0 : index
    %c0_7 = arith.constant 0 : index
    %20 = vector.load %arg2[%c0_6, %c0_7] : memref<24x8xbf16, #tpu.memory_space<vmem>>, vector<24x8xbf16>
    %cst_8 = arith.constant dense<0.000000e+00> : vector<24x256xf32>
    %21 = tpu.matmul %20, %19, %cst_8 {dimension_numbers = #tpu.dot_dimension_numbers<[1], [0], [0], [1], [0, 0, 1, 1], [], []>} : vector<24x8xbf16>, vector<8x256xbf16>, vector<24x256xf32> -> vector<24x256xf32>
    %c0_9 = arith.constant 0 : index
    %c0_10 = arith.constant 0 : index
    %22 = vector.load %arg3[%c0_9, %c0_10] : memref<24x1xf32, #tpu.memory_space<vmem>>, vector<24x1xf32>
    %23 = vector.broadcast %22 : vector<24x1xf32> to vector<24x256xf32>
    %24 = arith.addf %21, %23 : vector<24x256xf32>
    %25 = arith.truncf %24 : vector<24x256xf32> to vector<24x256xbf16>
    %c0_11 = arith.constant 0 : index
    %c0_12 = arith.constant 0 : index
    %c0_13 = arith.constant 0 : index
    %26 = vector.load %arg4[%c0_11, %c0_12, %c0_13] : memref<1x24x256xbf16, #tpu.memory_space<vmem>>, vector<1x24x256xbf16>
    %27 = vector.shape_cast %26 : vector<1x24x256xbf16> to vector<24x256xbf16>
    %28 = vector.shape_cast %25 : vector<24x256xbf16> to vector<1x24x256xbf16>
    tpu.vector_store %arg4[%c0_11, %c0_12, %c0_13], %28 {strides = array<i32>} : memref<1x24x256xbf16, #tpu.memory_space<vmem>>, vector<1x24x256xbf16>,
    return
  }
  func.func @transform_0(%arg0: i32) -> (i32, i32, i32) {
    %c0_i32 = arith.constant 0 : i32
    %c0_i32_0 = arith.constant 0 : i32
    %c0_i32_1 = arith.constant 0 : i32
    return %arg0, %c0_i32, %c0_i32_0 : i32, i32, i32
  }
  func.func @transform_1(%arg0: i32) -> (i32, i32) {
    %c0_i32 = arith.constant 0 : i32
    %c0_i32_0 = arith.constant 0 : i32
    %c0_i32_1 = arith.constant 0 : i32
    return %c0_i32, %c0_i32_0 : i32, i32
  }
  func.func @transform_2(%arg0: i32) -> (i32, i32) {
    %c0_i32 = arith.constant 0 : i32
    %c0_i32_0 = arith.constant 0 : i32
    %c0_i32_1 = arith.constant 0 : i32
    return %c0_i32, %c0_i32_0 : i32, i32
  }
  func.func @transform_3(%arg0: i32) -> (i32, i32, i32) {
    %c0_i32 = arith.constant 0 : i32
    %c0_i32_0 = arith.constant 0 : i32
    %c0_i32_1 = arith.constant 0 : i32
    return %arg0, %c0_i32, %c0_i32_0 : i32, i32, i32
  }
}

</mosaic_0001>

<bundles_post_ra>
// kernel: tpu_custom_call.1
= control target key start
LH: loop header
LB: loop body
LE: loop exit
PB: predicated region body
PF: predicated region fallthrough
CT: control target
= control target key end

     0   :  { %8 = vsyncpa [#allocation3], 0  ;;  %s669_s0 = inlined_call_operand.vmem [shape: f32[2,8,256], index: 0, kind: input, shape index: {}]   ;;  %s670_s1 = inlined_call_operand.vmem [shape: bf16[24,8], index: 1, kind: input, shape index: {}]   ;;  %s671_s2 = inlined_call_operand.vmem [shape: f32[24,1], index: 2, kind: input, shape index: {}]   ;;  %s672_s3 = inlined_call_operand.hbm [shape: bf16[2,24,256], index: 3, kind: output, shape index: {}]  }
   0x1   :  { %10 = vsyncpa [#allocation3 + $0x1], 0  ;;  %s565_s12 = smov 0   ;;  %s567_s13 = smov 0  }
   0x2   :  { %s569_s14 = smov 0   ;;  %s571_s15 = smov 0  }
   0x3 LB: > { %s586_s16 = sadd.s32 4294967295, %s539_s15   ;;  %s396_s17 = sadd.s32 4294967294, %s539_s15   ;;  %s539_s15 = sphi %s571_s15, %s678_s15   ;;  %s535_s14 = sphi %s569_s14, %s677_s14   ;;  %s531_s13 = sphi %s567_s13, %s676_s13   ;;  %s527_s12 = sphi %s565_s12, %s675_s12  }
   0x4   : > { %s590_s18 = sadd.s32 1, %s539_s15   ;;  %s91_s19 = sadd.s32 1, %s535_s14 }
   0x5   : > { %s88_s20 = ssub.s32 %s539_s15, %s590_s18  ;;  %p101_p0 = scmp.ne.s32.totalorder %s535_s14, %s531_s13 }
   0x6   : > { %p89_p1 = scmp.eq.s32.totalorder %s88_s20, 0  ;;  %p102_p2 = scmp.eq.s32.totalorder %s586_s16, 1 }
   0x7   : > { %p107_p3 = scmp.ne.s32.totalorder %s531_s13, %s527_s12  ;;  %p108_p4 = scmp.eq.s32.totalorder %s396_s17, 1 }
   0x8   : > { %s601_s21 = scalar_select %p89_p1, %s535_s14, %s91_s19  }
   0x9   : > { %p603_p5 = por %p102_p2, %p101_p0  ;;  %p607_p6 = por %p108_p4, %p107_p3 }
   0xa   : > { %p399_p7 = scmp.ge.s32.totalorder %s539_s15, 1  ;;  %p140_p8 = scmp.lt.s32.totalorder %s539_s15, 3 }
   0xc   : > { %p141_p9 = pnand %p399_p7, %p140_p8 }
   0xd   : > { %p164_p10 = scmp.lt.s32.totalorder (!%p141_p9), %s586_s16, 1  ;;  %s497_s20 = scalar_lea.hbm (!%p141_p9), %s672_s3, 48 }
   0xe   : > { %144 = sbr.rel (%p141_p9) target bundleno = 618 (0x26a), region = 32 }
  0x13   : > { %s165_s24 = scalar_select %p164_p10, %s586_s16, 1  ;;  %v541_v3 = vmov 2048.0   ;;  %v236_v38 = vld [vmem:[%s671_s2] sm:$0xff]  ;;  %v238_v39 = vld [vmem:[%s671_s2 + $0x10] sm:$0xff]  ;;  %v542_v40 = vmov 0   ;;  %v237_v41 = vld [vmem:[%s671_s2 + $0x8] sm:$0xff] }
  0x14   : > { %473 = vrcp.f32 %v541_v3  ;;  %470 = vset.pattern.permute.xlu1 %v542_v40  ;;  %471 = vset.pattern.permute.xlu2 %v542_v40  ;;  %v235_v42 = vld [vmem:[%s670_s1 + $0x8] sm:$0xf]  ;;  %vm269_vm4 = vcmask 1043456   ;;  %v414_v51 = vld [vmem:[%s670_s1] sm:$0xff]  ;;  %vm262_vm5 = vcmask 64512  }
  0x15   : > { %s413_s25 = sshll.u32 %s165_s24, 4  ;;  %241 = vperm.xlu1 %470, %v236_v38   ;;  %251 = vperm.xlu2 %471, %v238_v39   ;;  %v259_v46 = vunpack.c.l.b16 %v235_v42 }
  0x16   : > { %s168_s28 = scalar_lea.vmem %s669_s0, %s413_s25  ;;  %472 = vset.pattern.permute.xlu0 %v542_v40 }
  0x17   : > { %v170_v0 = vld [vmem:[%s168_s28] sm:$0xff]  ;;  %v171_v1 = vld [vmem:[%s168_s28 + $0x8] sm:$0xff]  ;;  %v261_v52 = vpack.c.b16 %v259_v46, %v259_v46  ;;  %s161_s28 = sand.u32 1, %s531_s13  }
  0x18   : > { %v172_v2 = vadd.f32 %v171_v1, %v170_v0 }
  0x1a   : > { %173 = vadd.xlane.f32.xlu0 %v172_v2  ;;  %v474_v4 = vpop.eup %473 }
  0x1b   : > { %v183_v5 = vmul.f32 2048.0, %v474_v4  ;;  %vm187_vm0 = vweird.f32 %v474_v4 }
  0x1d   : > { %v184_v6 = vsub.f32 1.0, %v183_v5  ;;  %246 = vperm.xlu1 %470, %v237_v41  }
  0x1f   : > { %v185_v10 = vmul.f32 %v474_v4, %v184_v6 }
  0x21   : > { %v186_v13 = vadd.f32 %v474_v4, %v185_v10 }
  0x23   : > { %v188_v16 = vsel %vm187_vm0, %v474_v4, %v186_v13 }
  0x6f   : > { %v252_v59 = vpop.permute.xlu2 %251 }
  0x87   : > { %v242_v53 = vpop.permute.xlu1 %241 }
  0x8d   : > { %v174_v7 = vpop.xlane.xlu0 %173 }
  0x8e   : > { %v175_v8 = vrot.slane %v174_v7, 4 }
  0x8f   : > { %v247_v63 = vpop.permute.xlu1 %246 }
  0x90   : > { %v176_v9 = vadd.f32 %v175_v8, %v174_v7 }
  0x92   : > { %v177_v11 = vrot.slane %v176_v9, 2 }
  0x94   : > { %v178_v12 = vadd.f32 %v177_v11, %v176_v9 }
  0x96   : > { %v179_v14 = vrot.slane %v178_v12, 1 }
  0x98   : > { %v180_v15 = vadd.f32 %v179_v14, %v178_v12 }
  0x9a   : > { %418 = vpush %v180_v15 }
  0x9b   : > { %420 = vpush %v188_v16 }
  0xcb   : > { %s419_s29 = spop %418 }
  0xcc   : > { %s421_s30 = spop %420 }
  0xcd   : > { %s190_s4 = smul.f32 %s421_s30, %s419_s29 }
  0xce   : > { %s417_s29 = smul.u32 24, %s161_s28 }
  0xcf   : > { %v191_v17 = vstv %s190_s4 }
  0xd0   : > { %v192_v18 = vsub.f32 %v170_v0, %v191_v17  ;;  %v193_v19 = vsub.f32 %v171_v1, %v191_v17 }
  0xd2   : > { %v194_v20 = vmul.f32 %v192_v18, %v192_v18  ;;  %v195_v21 = vmul.f32 %v193_v19, %v193_v19 }
  0xd4   : > { %v196_v22 = vadd.f32 %v195_v21, %v194_v20 }
  0xd6   : > { %197 = vadd.xlane.f32.xlu0 %v196_v22 }
 0x149   : > { %v198_v23 = vpop.xlane.xlu0 %197 }
 0x14a   : > { %v199_v24 = vrot.slane %v198_v23, 4 }
 0x14c   : > { %v200_v25 = vadd.f32 %v199_v24, %v198_v23 }
 0x14e   : > { %v201_v26 = vrot.slane %v200_v25, 2 }
 0x150   : > { %v202_v27 = vadd.f32 %v201_v26, %v200_v25 }
 0x152   : > { %v203_v28 = vrot.slane %v202_v27, 1 }
 0x154   : > { %v204_v29 = vadd.f32 %v203_v28, %v202_v27 }
 0x156   : > { %422 = vpush %v204_v29 }
 0x187   : > { %s423_s5 = spop %422 }
 0x188   : > { %s214_s6 = smul.f32 %s423_s5, %s421_s30 }
 0x189   : > { %s426_s30 = smul.u32 24, %s586_s16  ;;  %s319_s16 = scalar_lea.sflag [#allocation3], %s161_s28 }
 0x18a   : > { %s215_s7 = sadd.f32 1e-05, %s214_s6 }
 0x18b   : > { %s330_s6 = scalar_lea.hbm %s672_s3, %s426_s30 }
 0x18c   : > { %v216_v30 = vstv %s215_s7  ;;  %s163_s7 = scalar_lea.vmem [#allocation2], %s417_s29  ;;  %s333_s9 = sshll.u32 %s330_s6, 4  ;;  %s334_s9 = int_to_ptr.hbm [resolvable:$true] %s333_s9 }
 0x18d   : > { %475 = vrsqrt.f32 %v216_v30  ;;  %vm223_vm2 = vweird.f32 %v216_v30  ;;  %s331_s8 = sshll.u32 %s163_s7, 4  ;;  %s491_s10 = sshra.s32 %s334_s9, 4  ;;  %s332_s8 = int_to_ptr.vmem [resolvable:$true] %s331_s8  ;;  %s492_s10 = int_to_ptr.hbm [resolvable:$true] %s491_s10 }
 0x18e   : > { %s493_s11 = scalar_lea.hbm %s492_s10, 24  ;;  %p498_p0 = scmp.lt.s32.totalorder %s492_s10, %s672_s3 }
 0x18f   : > { %p494_p11 = scmp.ne.s32.totalorder %s492_s10, %s493_s11  ;;  %p499_p1 = scmp.lt.s32.totalorder %s497_s20, %s493_s11 }
 0x191   : > { %p495_p12 = pnand %p494_p11, %p603_p5  ;;  %p500_p2 = por %p499_p1, %p498_p0 }
 0x193   : > { %v476_v31 = vpop.eup %475  ;;  %p496_p13 = pneg %p495_p12 }
 0x194   : > { %v218_v32 = vmul.f32 %v476_v31, %v216_v30  ;;  %vm224_vm1 = vweird.f32 %v476_v31 }
 0x195   : > { %vm225_vm3 = vmor %vm223_vm2, %vm224_vm1  ;;  %p501_p3 = pnand %p500_p2, %p496_p13 }
 0x196   : > { %v219_v33 = vmul.f32 %v476_v31, %v218_v32 }
 0x198   : > { %v220_v34 = vmul.f32 0.5, %v219_v33 }
 0x19a   : > { %v221_v35 = vsub.f32 1.5, %v220_v34 }
 0x19c   : > { %v222_v36 = vmul.f32 %v476_v31, %v221_v35 }
 0x19e   : > { %v226_v37 = vsel %vm225_vm3, %v476_v31, %v222_v36 }
 0x19f   : > { %424 = vpush %v226_v37 }
 0x1d0   : > { %s425_s25 = spop %424 }
 0x1d1   : > { %v228_v43 = vstv %s425_s25 }
 0x1d2   : > { %v229_v44 = vmul.f32 %v228_v43, %v192_v18  ;;  %v230_v45 = vmul.f32 %v228_v43, %v193_v19 }
 0x1d4   : > { %v231_v47 = vpack.c.bf16 %v229_v44, %v229_v44  ;;  %v232_v48 = vpack.c.bf16 %v230_v45, %v230_v45 }
 0x1d6   : > { %v271_v49 = vsel %vm269_vm4, %v231_v47, 0  ;;  %v274_v50 = vsel %vm269_vm4, %v232_v48, 0 }
 0x1d7   : > { %283 = vmatpush.bf16.msra.mxu0 %v271_v49  ;;  %415 = vmatpush.bf16.msra.mxu2 %v271_v49 }
 0x1d8   : > { %301 = vmatpush.bf16.msra.mxu1 %v274_v50  ;;  %416 = vmatpush.bf16.msra.mxu3 %v274_v50 }
 0x1da   : > { %406 = vmatmul.msk.bf16.vlgmr.msra.gmra.mxu0 %vm262_vm5, %v414_v51  ;;  %407 = vmatmul.msk.bf16.vlgmr.msra.gmra.mxu2 %vm262_vm5, %v261_v52 }
 0x1db   : > { %408 = vmatmul.msk.bf16.vlgmr.msra.gmra.mxu1 %vm262_vm5, %v414_v51  ;;  %409 = vmatmul.msk.bf16.vlgmr.msra.gmra.mxu3 %vm262_vm5, %v261_v52 }
 0x257   : > { %v285_v54 = vpop.f32.mrf.mxu0 }
 0x258   : > { %v286_v55 = vadd.f32 %v285_v54, %v242_v53  ;;  %v303_v56 = vpop.f32.mrf.mxu1 }
 0x259   : > { %v304_v57 = vadd.f32 %v303_v56, %v242_v53 }
 0x25b   : > { %v312_v58 = vpack.c.bf16 %v304_v57, %v286_v55 }
 0x25d   : > { %315 = vst [vmem:[%s163_s7] sm:$0xff] %v312_v58  ;;  %v290_v60 = vpop.f32.mrf.mxu2 }
 0x25e   : > { %v291_v61 = vadd.f32 %v290_v60, %v252_v59  ;;  %v308_v62 = vpop.f32.mrf.mxu3 }
 0x25f   : > { %v309_v0 = vadd.f32 %v308_v62, %v252_v59  ;;  %v287_v1 = vpop.f32.mrf.mxu0 }
 0x260   : > { %v288_v2 = vadd.f32 %v287_v1, %v247_v63  ;;  %v305_v3 = vpop.f32.mrf.mxu1 }
 0x261   : > { %v314_v4 = vpack.c.bf16 %v309_v0, %v291_v61  ;;  %v306_v5 = vadd.f32 %v305_v3, %v247_v63 }
 0x263   : > { %317 = vst [vmem:[%s163_s7 + $0x10] sm:$0xff] %v314_v4  ;;  %v313_v6 = vpack.c.bf16 %v306_v5, %v288_v2 }
 0x265   : > { %316 = vst [vmem:[%s163_s7 + $0x8] sm:$0xff] %v313_v6  ;;  %v292_v7 = vpop.f32.mrf.mxu2 }
 0x266   : > { %v310_v8 = vpop.f32.mrf.mxu3 }
 0x267   : > { %504 = shalt.err (!%p501_p3)
}
 0x268   : > { %s543_s26 = smov 128   ;;  %s544_s27 = smov 8  }
 0x269   : > { %427 = dma.vmem_to_hbm [thread:$0]  (%p603_p5), %s332_s8, 384, %s334_s9, %s319_s16, %s543_s26, %s543_s26, %s544_s27  }
 0x26a PF: > { %p433_p4 = scmp.ge.s32.totalorder %s539_s15, 2  ;;  %s348_s28 = sand.u32 1, %s527_s12  }
 0x26b   : > { %s349_s29 = scalar_lea.sflag [#allocation3], %s348_s28 }
 0x26c   : > { %p430_p7 = pnand %p433_p4, %p607_p6 }
 0x26e   : > { %p431_p8 = pneg %p430_p7 }
 0x270   : > { %522 = dma.done.wait (%p431_p8), %s349_s29, 384  }
 0x271   : > { %524 = vsyncadd (%p431_p8), %s349_s29, 4294966912  ;;  %p13_p9 = scmp.ge.s32.totalorder %s590_s18, 4   ;;  %s675_s12 = smov %s531_s13 }
 0x272   : > { %s676_s13 = smov %s535_s14  ;;  %s677_s14 = smov %s601_s21 }
 0x273   : > { %s678_s15 = smov %s590_s18  ;;  %15 = sbr.rel (!%p13_p9) target bundleno = 3 (0x3), region = 67 }
 0x278   :  { %355 = vsyncpa [#allocation3], 1 }
 0x279   :  { %357 = vsyncpa [#allocation3 + $0x1], 1 }

</bundles_post_ra>
